<compile_context>
chip_gen: v7x
topology: tpu7x:2x2x1
jax: 0.10.0
libtpu: 0.0.40
codegen_flags: <defaults>
</compile_context>

<pallas_src>
import numpy as np
import jax
import jax.numpy as jnp
from jax.experimental import pallas as pl
from jax.experimental.pallas import tpu as pltpu


_NEG_MARGIN = 1.0  # ContrastiveLoss defaults: pos_margin=0.0, neg_margin=1.0


# ---------------------------------------------------------------------------
# Stage 1: L2-normalize rows (f32 math on VPU/EUP), zero-fill the lane pad,
# emit bf16 for the MXU.
# ---------------------------------------------------------------------------
def _make_normalize_kernel(d, d_pad):
    def kernel(x_ref, o_ref):
        x = x_ref[...].astype(jnp.float32)
        # Matches LpDistance(normalize_embeddings=True); eps handling differs
        # slightly from torch.nn.functional.normalize only for exactly-zero
        # rows.  Zero (padded) rows stay exactly zero.
        inv_norm = jax.lax.rsqrt(jnp.sum(x * x, axis=-1, keepdims=True) + 1e-12)
        y = (x * inv_norm).astype(jnp.bfloat16)
        if d_pad > d:
            y = jnp.concatenate(
                [y, jnp.zeros((y.shape[0], d_pad - d), jnp.bfloat16)], axis=-1)
        o_ref[...] = y
    return kernel


# ---------------------------------------------------------------------------
# Stage 2: upper-triangular tiled all-pairs contrastive loss.
# Per grid step: one (tile, tile) pair block -> 4 partial scalars written as
# an (8, 128) lane-dense output block (rows 0..3 = pos_sum, neg_sum, pos_cnt,
# neg_cnt).  No scratch accumulators => grid axis is "parallel".
# ---------------------------------------------------------------------------
def _pair_loss_kernel(ii_ref, jj_ref, msel_ref,          # scalar-prefetch (SMEM)
                      mask_ref, re_ref, ce_ref, rl_ref, cl_ref,  # inputs
                      out_ref):                            # output
    del ii_ref, jj_ref, msel_ref  # only used by the index_maps

    # MXU: bf16 operands, f32 accumulation; contract the shared feature dim of
    # both operands directly (no explicit .T / XLU transpose).
    sim = jax.lax.dot_general(
        re_ref[...], ce_ref[...],
        dimension_numbers=(((1,), (1,)), ((), ())),
        preferred_element_type=jnp.float32)                 # (tile, tile)
    sim = jnp.minimum(sim, 1.0)                             # 2 - 2*sim >= 0
    dist = jnp.sqrt(2.0 - 2.0 * sim)                        # ||ei - ej||, unit rows

    # Broadcast label compare: (tile,1) == (1,tile); padded rows (-1) never
    # match padded cols (-2) nor real (non-negative) labels, and padded
    # embeddings are zero vectors => dist = sqrt(2) => zero loss / zero count.
    same = rl_ref[...] == cl_ref[...]

    # 0/1 mask block chosen by the index_map: strict upper triangle on
    # diagonal tiles (kills self-pairs + double counting), all-ones otherwise.
    m = mask_ref[0]

    # pos_margin == 0 and dist >= 0, so the relu is a no-op: pos loss = dist.
    pos_loss = jnp.where(same, dist, 0.0) * m
    neg_loss = jnp.where(same, 0.0, jnp.maximum(_NEG_MARGIN - dist, 0.0)) * m

    pos_sum = jnp.sum(pos_loss)
    neg_sum = jnp.sum(neg_loss)
    pos_cnt = jnp.sum(jnp.where(pos_loss > 0.0, 1.0, 0.0))
    neg_cnt = jnp.sum(jnp.where(neg_loss > 0.0, 1.0, 0.0))

    # Pack the 4 partials into one lane-dense (8,128) vreg-sized block.
    row_id = jax.lax.broadcasted_iota(jnp.int32, (8, 128), 0)
    blk = (jnp.where(row_id == 0, pos_sum, 0.0)
           + jnp.where(row_id == 1, neg_sum, 0.0)
           + jnp.where(row_id == 2, pos_cnt, 0.0)
           + jnp.where(row_id == 3, neg_cnt, 0.0))
    out_ref[0] = blk


def contrastive_loss_pallas(embeddings, labels, indices_tuple=None):
    """ContrastiveLoss over all pairs. embeddings [N,D], labels [N] -> scalar."""
    # TODO(synk): indices_tuple (pair/triplet mining) is ignored, matching the
    #             default indices_tuple=None path of the PyTorch loss.
    del indices_tuple
    n, d = embeddings.shape

    d_pad = 128 * pl.cdiv(d, 128)        # MXU-friendly contraction width
    n_ceil = 128 * pl.cdiv(n, 128)
    # D-aware pair tile: 512 normally; cap at 256 for large D so double-
    # buffered bf16 tiles + (T,T) f32 temporaries fit v7x's 64 MiB VMEM.
    t_cap = 256 if d_pad >= 2048 else 512
    tile = min(t_cap, n_ceil)
    n_pad = tile * pl.cdiv(n, tile)

    # Row pad only (feature pad is done in-kernel).  Padded embedding rows are
    # exact zeros; padded labels use distinct sentinels for rows (-1) and
    # cols (-2) so padded pairs are never "same label".
    # TODO(synk): assumes real labels are non-negative (never -1/-2).
    emb = jnp.pad(embeddings.astype(jnp.float32), ((0, n_pad - n), (0, 0)))
    lab = labels.astype(jnp.int32)
    row_lab = jnp.pad(lab, (0, n_pad - n), constant_values=-1).reshape(n_pad, 1)
    col_lab = jnp.pad(lab, (0, n_pad - n), constant_values=-2).reshape(1, n_pad)

    # ---- Stage 1: normalize + bf16 cast (mem-bound streaming, 128-row blocks)
    r1 = 128
    norm_emb = pl.pallas_call(
        _make_normalize_kernel(d, d_pad),
        out_shape=jax.ShapeDtypeStruct((n_pad, d_pad), jnp.bfloat16),
        grid=(n_pad // r1,),
        in_specs=[pl.BlockSpec((r1, d), lambda i: (i, 0))],
        out_specs=pl.BlockSpec((r1, d_pad), lambda i: (i, 0)),
        compiler_params=pltpu.CompilerParams(
            dimension_semantics=("parallel",)),
    )(emb)

    # ---- Stage 2: upper-triangular tile-pair list (scalar-prefetched).
    t_tiles = n_pad // tile
    ii_np, jj_np = np.triu_indices(t_tiles)     # row-major: (i,i),(i,i+1),...
    num_pairs = int(ii_np.shape[0])
    ii = jnp.asarray(ii_np, dtype=jnp.int32)
    jj = jnp.asarray(jj_np, dtype=jnp.int32)
    msel = jnp.asarray((ii_np == jj_np).astype(np.int32))   # 1 = diagonal tile

    # Mask slabs: [0] all-ones (off-diagonal tiles), [1] strict upper triangle
    # (diagonal tiles: removes self-pairs and within-tile double counting).
    mask = jnp.stack([jnp.ones((tile, tile), jnp.float32),
                      jnp.triu(jnp.ones((tile, tile), jnp.float32), k=1)])

    out = pl.pallas_call(
        _pair_loss_kernel,
        out_shape=jax.ShapeDtypeStruct((num_pairs, 8, 128), jnp.float32),
        grid_spec=pltpu.PrefetchScalarGridSpec(
            num_scalar_prefetch=3,
            grid=(num_pairs,),
            in_specs=[
                # mask slab selected per tile pair (diag vs off-diag)
                pl.BlockSpec((1, tile, tile),
                             lambda t, ii, jj, ms: (ms[t], 0, 0)),
                # row / col embedding tiles
                pl.BlockSpec((tile, d_pad), lambda t, ii, jj, ms: (ii[t], 0)),
                pl.BlockSpec((tile, d_pad), lambda t, ii, jj, ms: (jj[t], 0)),
                # row labels (tile,1) and lane-dense col labels (1,tile)
                pl.BlockSpec((tile, 1), lambda t, ii, jj, ms: (ii[t], 0)),
                pl.BlockSpec((1, tile), lambda t, ii, jj, ms: (0, jj[t])),
            ],
            out_specs=pl.BlockSpec((1, 8, 128),
                                   lambda t, ii, jj, ms: (t, 0, 0)),
        ),
        compiler_params=pltpu.CompilerParams(
            dimension_semantics=("parallel",),       # megacore-shardable (v7x)
            vmem_limit_bytes=48 * 1024 * 1024),      # explicit, fits v7x 64MiB
    )(ii, jj, msel, mask, norm_emb, norm_emb, row_lab, col_lab)

    # Tiny final reduce + AvgNonZero divides in plain JAX.
    parts = out[:, :4, 0]                       # (num_pairs, 4)
    sums = jnp.sum(parts, axis=0)               # pos_sum, neg_sum, pos_cnt, neg_cnt
    pos_mean = sums[0] / jnp.maximum(sums[2], 1.0)
    neg_mean = sums[1] / jnp.maximum(sums[3], 1.0)
    return pos_mean + neg_mean


# ---------------------------------------------------------------------------
# DistributedLossWrapper equivalent
# ---------------------------------------------------------------------------
def is_distributed():
    # Mirrors torch.distributed.is_available() and is_initialized(): this is a
    # single-process JAX program, so the all-gather is the identity.
    return False


def all_gather_embeddings_labels(embeddings, labels):
    if not is_distributed():
        return embeddings, labels
    # TODO(synk): multi-host path would fuse a ring of
    #             pltpu.make_async_remote_copy steps with the per-column-tile
    #             loss loop (compute/comm overlap) instead of a separate
    #             jax.lax.all_gather of the full [world*N, D] array.
    return embeddings, labels


class DistributedLossWrapper:
    def __init__(self, loss):
        self.loss = loss

    def __call__(self, embeddings, labels, indices_tuple=None):
        embeddings, labels = all_gather_embeddings_labels(embeddings, labels)
        return self.loss(embeddings, labels, indices_tuple)


# ---------------------------------------------------------------------------
# Pure-JAX reference (f32, direct ||ei - ej||, full pair matrix) for a
# tolerance check.  The kernel counts each unordered pair once; the reference
# counts it twice — AvgNonZero ratios are identical.
# ---------------------------------------------------------------------------
def _reference_loss(embeddings, labels):
    e = embeddings.astype(jnp.float32)
    e = e * jax.lax.rsqrt(jnp.sum(e * e, axis=-1, keepdims=True) + 1e-12)
    diff = e[:, None, :] - e[None, :, :]
    dist = jnp.sqrt(jnp.maximum(jnp.sum(diff * diff, axis=-1), 0.0))
    same = labels[:, None] == labels[None, :]
    not_diag = ~jnp.eye(e.shape[0], dtype=bool)
    pos = jnp.where(same & not_diag, dist, 0.0)
    neg = jnp.where(~same, jnp.maximum(_NEG_MARGIN - dist, 0.0), 0.0)
    pos_mean = jnp.sum(pos) / jnp.maximum(jnp.sum(pos > 0).astype(jnp.float32), 1.0)
    neg_mean = jnp.sum(neg) / jnp.maximum(jnp.sum(neg > 0).astype(jnp.float32), 1.0)
    return pos_mean + neg_mean


# ---------------------------------------------------------------------------
# Demo
# ---------------------------------------------------------------------------
if __name__ == "__main__":
    key = jax.random.PRNGKey(0)
    k_emb, k_lab = jax.random.split(key)

    N, D = 8, 32  # small shapes: batch=8, hidden=32
    embeddings = jax.random.normal(k_emb, (N, D), dtype=jnp.float32)
    labels = jax.random.randint(k_lab, (N,), 0, 4, dtype=jnp.int32)

    wrapper = DistributedLossWrapper(contrastive_loss_pallas)
    loss = jax.block_until_ready(wrapper(embeddings, labels))
    ref = jax.block_until_ready(_reference_loss(embeddings, labels))

    assert loss.shape == () and bool(jnp.isfinite(loss))
    # bf16 MXU operands -> loose tolerance vs the f32 reference.
    assert abs(float(loss) - float(ref)) <= 0.05 + 0.05 * abs(float(ref)), (loss, ref)
    print("KERNEL_OK")
</pallas_src>

<mosaic_0001>
module attributes {stable_mosaic.version = 11 : i64} {
  func.func @kernel(%arg0: i32, %arg1: memref<128x32xf32, #tpu.memory_space<vmem>>, %arg2: memref<128x128xbf16, #tpu.memory_space<vmem>>) attributes {dimension_semantics = [#tpu.dimension_semantics<parallel>], iteration_bounds = array<i64: 1>, scalar_prefetch = 0 : i64, scratch_operands = 0 : i64, tpu.core_type = #tpu.core_type<tc>, window_params = [{transform_indices = @transform_0, window_bounds = array<i64: 128, 32>}, {transform_indices = @transform_1, window_bounds = array<i64: 128, 128>}]} {
    %c0 = arith.constant 0 : index
    %c0_0 = arith.constant 0 : index
    %0 = vector.load %arg1[%c0, %c0_0] : memref<128x32xf32, #tpu.memory_space<vmem>>, vector<128x32xf32>
    %1 = arith.mulf %0, %0 : vector<128x32xf32>
    %cst = arith.constant dense<0.000000e+00> : vector<128xf32>
    %2 = vector.multi_reduction <add>, %1, %cst [1] : vector<128x32xf32> to vector<128xf32>
    %3 = vector.shape_cast %2 : vector<128xf32> to vector<128x1xf32>
    %cst_1 = arith.constant 9.99999996E-13 : f32
    %4 = vector.broadcast %cst_1 : f32 to vector<128x1xf32>
    %5 = arith.addf %3, %4 : vector<128x1xf32>
    %6 = math.rsqrt %5 : vector<128x1xf32>
    %7 = vector.broadcast %6 : vector<128x1xf32> to vector<128x32xf32>
    %8 = arith.mulf %0, %7 : vector<128x32xf32>
    %9 = arith.truncf %8 : vector<128x32xf32> to vector<128x32xbf16>
    %cst_2 = arith.constant 0.000000e+00 : bf16
    %10 = vector.broadcast %cst_2 : bf16 to vector<128x96xbf16>
    %11 = tpu.concatenate %9, %10 in 1 : vector<128x32xbf16>, vector<128x96xbf16> -> vector<128x128xbf16>
    %c0_3 = arith.constant 0 : index
    %c0_4 = arith.constant 0 : index
    %12 = vector.load %arg2[%c0_3, %c0_4] : memref<128x128xbf16, #tpu.memory_space<vmem>>, vector<128x128xbf16>
    tpu.vector_store %arg2[%c0_3, %c0_4], %11 {strides = array<i32>} : memref<128x128xbf16, #tpu.memory_space<vmem>>, vector<128x128xbf16>,
    return
  }
  func.func @transform_0(%arg0: i32) -> (i32, i32) {
    %c0_i32 = arith.constant 0 : i32
    %c0_i32_0 = arith.constant 0 : i32
    return %arg0, %c0_i32 : i32, i32
  }
  func.func @transform_1(%arg0: i32) -> (i32, i32) {
    %c0_i32 = arith.constant 0 : i32
    %c0_i32_0 = arith.constant 0 : i32
    return %arg0, %c0_i32 : i32, i32
  }
}

</mosaic_0001>

<bundles_post_ra>
// kernel: tpu_custom_call.1
= control target key start
LH: loop header
LB: loop body
LE: loop exit
PB: predicated region body
PF: predicated region fallthrough
CT: control target
= control target key end

     0   :  { %vm42_vm0 = vcmask 261120   ;;  %s504_s0 = inlined_call_operand.vmem [shape: f32[128,32], index: 0, kind: input, shape index: {}]   ;;  %s505_s1 = inlined_call_operand.hbm [shape: bf16[128,128], index: 1, kind: output, shape index: {}]  }
   0x1   :  { %v343_v0 = vld [vmem:[%s504_s0 + $0x10] sm:$0xff]  ;;  %v348_v1 = vld [vmem:[%s504_s0] sm:$0xff]  ;;  %v353_v2 = vld [vmem:[%s504_s0 + $0x18] sm:$0xff] }
   0x2   :  { %v28_v3 = vmul.f32 %v343_v0, %v343_v0  ;;  %v26_v4 = vmul.f32 %v348_v1, %v348_v1  ;;  %v29_v5 = vmul.f32 %v353_v2, %v353_v2  ;;  %v364_v6 = vld [vmem:[%s504_s0 + $0x8] sm:$0xff]  ;;  %v376_v9 = vld [vmem:[%s504_s0 + $0x20] sm:$0xff] }
   0x3   :  { %v27_v7 = vmul.f32 %v364_v6, %v364_v6  ;;  %v371_v8 = vld [vmem:[%s504_s0 + $0x28] sm:$0xff]  ;;  %v30_v15 = vmul.f32 %v376_v9, %v376_v9 }
   0x4   :  { %v49_v10 = vsel %vm42_vm0, %v28_v3, 0.0  ;;  %v43_v11 = vsel %vm42_vm0, %v26_v4, 0.0  ;;  %v52_v12 = vsel %vm42_vm0, %v29_v5, 0.0  ;;  %v31_v14 = vmul.f32 %v371_v8, %v371_v8 }
   0x5   :  { %50 = vadd.xlane.f32.xlu1 %v49_v10  ;;  %44 = vadd.xlane.f32.xlu0 %v43_v11  ;;  %v46_v13 = vsel %vm42_vm0, %v27_v7, 0.0 }
   0x6   :  { %6 = vsyncpa [#allocation3], 0  ;;  %v389_v16 = vld [vmem:[%s504_s0 + $0x38] sm:$0xff]  ;;  %v394_v17 = vld [vmem:[%s504_s0 + $0x30] sm:$0xff]  ;;  %v58_v18 = vsel %vm42_vm0, %v31_v14, 0.0  ;;  %v55_v19 = vsel %vm42_vm0, %v30_v15, 0.0 }
   0x7   :  { %v33_v20 = vmul.f32 %v389_v16, %v389_v16  ;;  %v32_v21 = vmul.f32 %v394_v17, %v394_v17  ;;  %v405_v22 = vld [vmem:[%s504_s0 + $0x48] sm:$0xff]  ;;  %v410_v23 = vld [vmem:[%s504_s0 + $0x40] sm:$0xff]  ;;  %v421_v28 = vld [vmem:[%s504_s0 + $0x58] sm:$0xff] }
   0x8   :  { %v35_v26 = vmul.f32 %v405_v22, %v405_v22  ;;  %v34_v27 = vmul.f32 %v410_v23, %v410_v23  ;;  %v426_v29 = vld [vmem:[%s504_s0 + $0x50] sm:$0xff]  ;;  %v37_v32 = vmul.f32 %v421_v28, %v421_v28  ;;  %v437_v34 = vld [vmem:[%s504_s0 + $0x68] sm:$0xff]  ;;  %v442_v35 = vld [vmem:[%s504_s0 + $0x60] sm:$0xff] }
   0x9   :  { %53 = vadd.xlane.f32.xlu1 %v52_v12  ;;  %47 = vadd.xlane.f32.xlu0 %v46_v13  ;;  %v64_v24 = vsel %vm42_vm0, %v33_v20, 0.0  ;;  %v61_v25 = vsel %vm42_vm0, %v32_v21, 0.0  ;;  %v36_v33 = vmul.f32 %v426_v29, %v426_v29  ;;  %v39_v38 = vmul.f32 %v437_v34, %v437_v34  ;;  %v453_v40 = vld [vmem:[%s504_s0 + $0x78] sm:$0xff]  ;;  %v458_v41 = vld [vmem:[%s504_s0 + $0x70] sm:$0xff]  ;;  %s327_s0 = smov [#allocation2]  }
   0xa   :  { %v70_v30 = vsel %vm42_vm0, %v35_v26, 0.0  ;;  %v67_v31 = vsel %vm42_vm0, %v34_v27, 0.0  ;;  %v76_v36 = vsel %vm42_vm0, %v37_v32, 0.0  ;;  %v38_v39 = vmul.f32 %v442_v35, %v442_v35  ;;  %s241_s9 = sshll.u32 %s327_s0, 4  ;;  %s242_s9 = int_to_ptr.vmem [resolvable:$true] %s241_s9 }
   0xb   :  { %v73_v37 = vsel %vm42_vm0, %v36_v33, 0.0  ;;  %v82_v42 = vsel %vm42_vm0, %v39_v38, 0.0  ;;  %v41_v44 = vmul.f32 %v453_v40, %v453_v40  ;;  %v40_v45 = vmul.f32 %v458_v41, %v458_v41  ;;  %s303_s10 = scalar_lea.vmem %s242_s9, 1024  ;;  %p308_p1 = scmp.lt.s32.totalorder %s242_s9, %s242_s9 }
   0xc   :  { %v79_v43 = vsel %vm42_vm0, %v38_v39, 0.0  ;;  %p304_p0 = scmp.ne.s32.totalorder %s242_s9, %s303_s10  ;;  %p309_p2 = scmp.lt.s32.totalorder %s303_s10, %s303_s10 }
   0xd   :  { %59 = vadd.xlane.f32.xlu1 %v58_v18  ;;  %56 = vadd.xlane.f32.xlu0 %v55_v19  ;;  %v88_v46 = vsel %vm42_vm0, %v41_v44, 0.0  ;;  %v85_v47 = vsel %vm42_vm0, %v40_v45, 0.0 }
   0xe   :  { %p310_p3 = por %p309_p2, %p308_p1 }
  0x10   :  { %p311_p4 = pnand %p310_p3, %p304_p0 }
  0x11   :  { %65 = vadd.xlane.f32.xlu1 %v64_v24  ;;  %62 = vadd.xlane.f32.xlu0 %v61_v25 }
  0x15   :  { %71 = vadd.xlane.f32.xlu1 %v70_v30  ;;  %68 = vadd.xlane.f32.xlu0 %v67_v31 }
  0x19   :  { %77 = vadd.xlane.f32.xlu1 %v76_v36  ;;  %74 = vadd.xlane.f32.xlu0 %v73_v37 }
  0x1d   :  { %83 = vadd.xlane.f32.xlu1 %v82_v42  ;;  %80 = vadd.xlane.f32.xlu0 %v79_v43 }
  0x21   :  { %89 = vadd.xlane.f32.xlu1 %v88_v46  ;;  %86 = vadd.xlane.f32.xlu0 %v85_v47 }
  0x92   :  { %v51_v48 = vpop.xlane.xlu1 %50  ;;  %v45_v49 = vpop.xlane.xlu0 %44 }
  0x93   :  { %v93_v50 = vadd.f32 1e-12, %v51_v48  ;;  %v91_v51 = vadd.f32 1e-12, %v45_v49 }
  0x95   :  { %271 = vrsqrt.f32 %v93_v50 }
  0x96   :  { %v54_v52 = vpop.xlane.xlu1 %53  ;;  %v48_v53 = vpop.xlane.xlu0 %47  ;;  %273 = vrsqrt.f32 %v91_v51 }
  0x97   :  { %v94_v54 = vadd.f32 1e-12, %v54_v52  ;;  %v92_v55 = vadd.f32 1e-12, %v48_v53 }
  0x99   :  { %275 = vrsqrt.f32 %v94_v54 }
  0x9a   :  { %277 = vrsqrt.f32 %v92_v55  ;;  %v60_v56 = vpop.xlane.xlu1 %59  ;;  %v57_v57 = vpop.xlane.xlu0 %56 }
  0x9b   :  { %v96_v58 = vadd.f32 1e-12, %v60_v56  ;;  %v95_v59 = vadd.f32 1e-12, %v57_v57 }
  0x9d   :  { %279 = vrsqrt.f32 %v96_v58 }
  0x9e   :  { %281 = vrsqrt.f32 %v95_v59  ;;  %v66_v60 = vpop.xlane.xlu1 %65  ;;  %v63_v61 = vpop.xlane.xlu0 %62 }
  0x9f   :  { %v98_v62 = vadd.f32 1e-12, %v66_v60  ;;  %v97_v63 = vadd.f32 1e-12, %v63_v61  ;;  %v272_v3 = vpop.eup %271 }
  0xa0   :  { %v274_v4 = vpop.eup %273  ;;  %v125_v14 = vmul.f32 %v272_v3, %v343_v0 }
  0xa1   :  { %283 = vrsqrt.f32 %v98_v62  ;;  %v123_v18 = vmul.f32 %v274_v4, %v348_v1 }
  0xa2   :  { %285 = vrsqrt.f32 %v97_v63  ;;  %v72_v5 = vpop.xlane.xlu1 %71  ;;  %v69_v7 = vpop.xlane.xlu0 %68 }
  0xa3   :  { %v276_v10 = vpop.eup %275  ;;  %v100_v11 = vadd.f32 1e-12, %v72_v5  ;;  %v99_v12 = vadd.f32 1e-12, %v69_v7 }
  0xa4   :  { %v278_v13 = vpop.eup %277  ;;  %v126_v15 = vmul.f32 %v276_v10, %v353_v2 }
  0xa5   :  { %v124_v19 = vmul.f32 %v278_v13, %v364_v6  ;;  %287 = vrsqrt.f32 %v100_v11 }
  0xa6   :  { %v140_v20 = vpack.c.bf16 %v126_v15, %v125_v14  ;;  %289 = vrsqrt.f32 %v99_v12  ;;  %v78_v21 = vpop.xlane.xlu1 %77  ;;  %v75_v24 = vpop.xlane.xlu0 %74 }
  0xa7   :  { %v280_v25 = vpop.eup %279  ;;  %v139_v26 = vpack.c.bf16 %v124_v19, %v123_v18  ;;  %v102_v27 = vadd.f32 1e-12, %v78_v21  ;;  %v101_v30 = vadd.f32 1e-12, %v75_v24 }
  0xa8   :  { %v282_v31 = vpop.eup %281  ;;  %v151_v32 = vsel %vm42_vm0, %v140_v20, 0  ;;  %v128_v0 = vmul.f32 %v280_v25, %v371_v8 }
  0xa9   :  { %v254_v33 = vcombine.low %v151_v32, %v151_v32  ;;  %v255_v2 = vcombine.high %v151_v32, %v151_v32  ;;  %v149_v1 = vsel %vm42_vm0, %v139_v26, 0  ;;  %v127_v6 = vmul.f32 %v282_v31, %v376_v9 }
  0xaa   :  { %v252_v36 = vcombine.low %v149_v1, %v149_v1  ;;  %v253_v37 = vcombine.high %v149_v1, %v149_v1  ;;  %291 = vrsqrt.f32 %v102_v27  ;;  %v84_v38 = vpop.xlane.xlu1 %83  ;;  %v81_v39 = vpop.xlane.xlu0 %80 }
  0xab   :  { %v284_v42 = vpop.eup %283  ;;  %222 = vst [vmem:[#allocation2 + $0x8] sm:$0xf] %v254_v33  ;;  %223 = vst [vmem:[#allocation2 + $0xc] sm:$0xf] %v255_v2  ;;  %v141_v43 = vpack.c.bf16 %v128_v0, %v127_v6  ;;  %293 = vrsqrt.f32 %v101_v30  ;;  %v104_v44 = vadd.f32 1e-12, %v84_v38 }
  0xac   :  { %v103_v45 = vadd.f32 1e-12, %v81_v39  ;;  %v286_v46 = vpop.eup %285  ;;  %220 = vst [vmem:[#allocation2] sm:$0xf] %v252_v36  ;;  %221 = vst [vmem:[#allocation2 + $0x4] sm:$0xf] %v253_v37  ;;  %v130_v8 = vmul.f32 %v284_v42, %v389_v16 }
  0xad   :  { %v153_v47 = vsel %vm42_vm0, %v141_v43, 0  ;;  %v129_v9 = vmul.f32 %v286_v46, %v394_v17  ;;  %295 = vrsqrt.f32 %v104_v44 }
  0xae   :  { %v256_v48 = vcombine.low %v153_v47, %v153_v47  ;;  %v257_v49 = vcombine.high %v153_v47, %v153_v47  ;;  %297 = vrsqrt.f32 %v103_v45  ;;  %v90_v50 = vpop.xlane.xlu1 %89  ;;  %v87_v51 = vpop.xlane.xlu0 %86 }
  0xaf   :  { %v288_v52 = vpop.eup %287  ;;  %v142_v53 = vpack.c.bf16 %v130_v8, %v129_v9  ;;  %v106_v54 = vadd.f32 1e-12, %v90_v50  ;;  %v105_v55 = vadd.f32 1e-12, %v87_v51 }
  0xb0   :  { %v290_v56 = vpop.eup %289  ;;  %224 = vst [vmem:[#allocation2 + $0x10] sm:$0xf] %v256_v48  ;;  %225 = vst [vmem:[#allocation2 + $0x14] sm:$0xf] %v257_v49  ;;  %v132_v57 = vmul.f32 %v288_v52, %v405_v22 }
  0xb1   :  { %v155_v16 = vsel %vm42_vm0, %v142_v53, 0  ;;  %v131_v58 = vmul.f32 %v290_v56, %v410_v23  ;;  %299 = vrsqrt.f32 %v106_v54 }
  0xb2   :  { %v258_v17 = vcombine.low %v155_v16, %v155_v16  ;;  %v259_v59 = vcombine.high %v155_v16, %v155_v16  ;;  %301 = vrsqrt.f32 %v105_v55 }
  0xb3   :  { %v143_v60 = vpack.c.bf16 %v132_v57, %v131_v58 }
  0xb4   :  { %v292_v61 = vpop.eup %291  ;;  %226 = vst [vmem:[#allocation2 + $0x18] sm:$0xf] %v258_v17  ;;  %227 = vst [vmem:[#allocation2 + $0x1c] sm:$0xf] %v259_v59 }
  0xb5   :  { %v294_v62 = vpop.eup %293  ;;  %v157_v63 = vsel %vm42_vm0, %v143_v60, 0  ;;  %v134_v3 = vmul.f32 %v292_v61, %v421_v28 }
  0xb6   :  { %v260_v4 = vcombine.low %v157_v63, %v157_v63  ;;  %v261_v5 = vcombine.high %v157_v63, %v157_v63  ;;  %v133_v22 = vmul.f32 %v294_v62, %v426_v29 }
  0xb7   :  { %v296_v7 = vpop.eup %295 }
  0xb8   :  { %v298_v10 = vpop.eup %297  ;;  %228 = vst [vmem:[#allocation2 + $0x20] sm:$0xf] %v260_v4  ;;  %229 = vst [vmem:[#allocation2 + $0x24] sm:$0xf] %v261_v5  ;;  %v144_v23 = vpack.c.bf16 %v134_v3, %v133_v22  ;;  %v136_v11 = vmul.f32 %v296_v7, %v437_v34 }
  0xb9   :  { %v135_v12 = vmul.f32 %v298_v10, %v442_v35 }
  0xba   :  { %v159_v13 = vsel %vm42_vm0, %v144_v23, 0 }
  0xbb   :  { %v300_v14 = vpop.eup %299  ;;  %v262_v15 = vcombine.low %v159_v13, %v159_v13  ;;  %v263_v18 = vcombine.high %v159_v13, %v159_v13  ;;  %v145_v19 = vpack.c.bf16 %v136_v11, %v135_v12 }
  0xbc   :  { %v302_v28 = vpop.eup %301  ;;  %v138_v20 = vmul.f32 %v300_v14, %v453_v40 }
  0xbd   :  { %230 = vst [vmem:[#allocation2 + $0x28] sm:$0xf] %v262_v15  ;;  %231 = vst [vmem:[#allocation2 + $0x2c] sm:$0xf] %v263_v18  ;;  %v161_v29 = vsel %vm42_vm0, %v145_v19, 0  ;;  %v137_v21 = vmul.f32 %v302_v28, %v458_v41 }
  0xbe   :  { %v264_v24 = vcombine.low %v161_v29, %v161_v29  ;;  %v265_v25 = vcombine.high %v161_v29, %v161_v29 }
  0xbf   :  { %v146_v34 = vpack.c.bf16 %v138_v20, %v137_v21 }
  0xc0   :  { %232 = vst [vmem:[#allocation2 + $0x30] sm:$0xf] %v264_v24  ;;  %233 = vst [vmem:[#allocation2 + $0x34] sm:$0xf] %v265_v25 }
  0xc1   :  { %v163_v35 = vsel %vm42_vm0, %v146_v34, 0 }
  0xc2   :  { %v266_v26 = vcombine.low %v163_v35, %v163_v35  ;;  %v267_v27 = vcombine.high %v163_v35, %v163_v35 }
  0xc4   :  { %234 = vst [vmem:[#allocation2 + $0x38] sm:$0xf] %v266_v26  ;;  %235 = vst [vmem:[#allocation2 + $0x3c] sm:$0xf] %v267_v27 }
  0xc5   :  { %314 = shalt.err (!%p311_p4)
}
  0xc6   :  { %s315_s13 = scalar_lea.hbm %s505_s1, 1024 }
  0xc7   :  { %p316_p5 = scmp.ne.s32.totalorder %s505_s1, %s315_s13  ;;  %p319_p6 = scmp.lt.u32.totalorder %s315_s13, %s505_s1 }
  0xc9   :  { %p321_p7 = pnand %p319_p6, %p316_p5 }
  0xcb   :  { %324 = shalt.err (!%p321_p7)
}
  0xcc   :  { %s328_s18 = smov 64   ;;  %s329_s19 = smov 4  }
  0xcd   :  { %247 = dma.vmem_to_hbm [thread:$0]  %s242_s9, 1024, %s505_s1, [#allocation3], %s328_s18, %s328_s18, %s329_s19  }
  0xce   :  { %325 = dma.done.wait [#allocation3], 1024  }
  0xcf   :  { %326 = vsyncadd [#allocation3], 4294966272 }
  0xd0   :  { %251 = vsyncpa [#allocation3], 1 }

</bundles_post_ra>
